<compile_context>
chip_gen: v7x
topology: tpu7x:2x2x1
jax: 0.10.0
libtpu: 0.0.40
codegen_flags: <defaults>
</compile_context>

<pallas_src>
import functools
import math

import jax
import jax.numpy as jnp
from jax import lax
from jax.experimental import pallas as pl
from jax.experimental.pallas import tpu as pltpu

LANES = 128
ACC_ROWS = 64                 # (64,128) f32 carry = 8 vregs -> 8 add chains
CHUNK_ROWS = 128              # rows per inner fori_loop iteration
ROW_ALIGN = CHUNK_ROWS        # block_rows is a multiple of the chunk size
TARGET_BLOCK_BYTES = 4 * 1024 * 1024    # ~4 MiB per input stream per block
VMEM_LIMIT_BYTES = 40 * 1024 * 1024     # safe on v7x (64 MiB phys VMEM)


def _round_up(x, m):
    return ((x + m - 1) // m) * m


def _num_tensorcores():
    """Best-effort TensorCore count (v7x: 2/chip, v5e/v6e: 1). Defaults to 1."""
    try:
        info = pltpu.get_tpu_info()
    except Exception:
        return 1
    for attr in ("num_cores", "core_count", "num_tensorcores",
                 "tensorcores_per_chip", "cores_per_chip"):
        v = getattr(info, attr, None)
        if isinstance(v, int) and v in (1, 2):
            return v
    return 1


def _block_plan(n, max_itemsize, num_splits):
    """Pick (block_rows, n_pad, steps) for a per-task stream of n elements.

    n_pad = num_splits * steps * block_rows * LANES; block_rows % CHUNK_ROWS == 0.
    block_rows is dtype-aware: the widest stream's block is ~TARGET_BLOCK_BYTES.
    """
    max_rows = max(
        ROW_ALIGN,
        (TARGET_BLOCK_BYTES // (LANES * max_itemsize)) // ROW_ALIGN * ROW_ALIGN,
    )
    rows_needed = _round_up(max(1, -(-n // (num_splits * LANES))), ROW_ALIGN)
    block_rows = min(max_rows, rows_needed)
    per_sweep = num_splits * block_rows * LANES
    n_pad = _round_up(n, per_sweep)
    steps = n_pad // per_sweep
    return block_rows, n_pad, steps


def _ewc_kernel(f_ref, p_ref, q_ref, o_ref, *, scale, block_rows):
    # grid = (num_splits, steps, tasks); axes 1 and 2 are the reduction sweep
    # for this split; the output block (c, 0) stays resident across them.
    i = pl.program_id(1)
    t = pl.program_id(2)
    is_first = jnp.logical_and(i == 0, t == 0)
    is_last = jnp.logical_and(i == pl.num_programs(1) - 1,
                              t == pl.num_programs(2) - 1)

    @pl.when(is_first)
    def _():
        o_ref[...] = jnp.zeros_like(o_ref)

    n_iters = block_rows // CHUNK_ROWS

    def body(it, acc):
        off = pl.multiple_of(it * CHUNK_ROWS, CHUNK_ROWS)
        f = f_ref[pl.ds(off, CHUNK_ROWS), :].astype(jnp.float32)
        d = (p_ref[pl.ds(off, CHUNK_ROWS), :].astype(jnp.float32)
             - q_ref[pl.ds(off, CHUNK_ROWS), :].astype(jnp.float32))
        term = f * d * d                                     # (128, 128) chunk
        # Fold the chunk onto the (64,128) carry with pure VPU adds.
        return acc + jnp.sum(term.reshape(-1, ACC_ROWS, LANES), axis=0)

    acc = lax.fori_loop(0, n_iters, body,
                        jnp.zeros((ACC_ROWS, LANES), jnp.float32),
                        unroll=min(n_iters, 4))
    o_ref[...] += acc

    @pl.when(is_last)
    def _():
        o_ref[...] = o_ref[...] * scale


def ewc_loss_pallas(fisher_trc, new_rc, old_trc, ewc_lambda, *,
                    block_rows, steps, num_splits):
    """fisher_trc/old_trc: [T, R, 128]; new_rc: [R, 128]; returns scalar f32."""
    T, R, _ = fisher_trc.shape
    assert new_rc.shape == (R, LANES) and old_trc.shape == (T, R, LANES)
    assert R == num_splits * steps * block_rows

    fq_map = lambda c, i, t: (t, c * steps + i, 0)      # noqa: E731
    p_map = lambda c, i, t: (c * steps + i, 0)          # noqa: E731  (task-invariant)

    bytes_accessed = int(
        fisher_trc.size * fisher_trc.dtype.itemsize
        + old_trc.size * old_trc.dtype.itemsize
        + new_rc.size * new_rc.dtype.itemsize           # read once (dedup'd)
        + num_splits * ACC_ROWS * LANES * 4
    )
    cost = pl.CostEstimate(flops=4 * T * R * LANES, transcendentals=0,
                           bytes_accessed=bytes_accessed)

    kernel = functools.partial(_ewc_kernel, scale=float(ewc_lambda) / 2.0,
                               block_rows=block_rows)

    out = pl.pallas_call(
        kernel,
        out_shape=jax.ShapeDtypeStruct((num_splits * ACC_ROWS, LANES), jnp.float32),
        grid_spec=pltpu.PrefetchScalarGridSpec(
            num_scalar_prefetch=0,
            grid=(num_splits, steps, T),
            in_specs=[
                pl.BlockSpec((None, block_rows, LANES), fq_map),   # fisher
                pl.BlockSpec((block_rows, LANES), p_map),          # current params
                pl.BlockSpec((None, block_rows, LANES), fq_map),   # consolidated params
            ],
            out_specs=pl.BlockSpec((ACC_ROWS, LANES), lambda c, i, t: (c, 0)),
        ),
        compiler_params=pltpu.CompilerParams(
            dimension_semantics=("parallel", "arbitrary", "arbitrary"),
            vmem_limit_bytes=VMEM_LIMIT_BYTES,
        ),
        cost_estimate=cost,
    )(fisher_trc, new_rc, old_trc)

    # Tiny final cross-lane/sublane reduce of the partial-sum slab.
    return jnp.sum(out)


class EWCLossPallas:
    """Mirror of the PyTorch EWCLoss module.

    fisher / params are assumed fixed after construction (as in typical EWC
    usage); their packed streams are cached lazily on first call.
    """

    def __init__(self, ewc_lambda=0.4, fisher=None, params=None):
        self.ewc_lambda = float(ewc_lambda)
        self.fisher = fisher if fisher is not None else {}
        self.params = params if params is not None else {}
        self._num_splits = _num_tensorcores()
        self._cache_key = None
        self._cache = None

    @staticmethod
    def _pack(chunks, dtype, n, n_pad):
        v = jnp.concatenate([jnp.ravel(c).astype(dtype) for c in chunks])
        if n_pad > n:
            v = jnp.concatenate([v, jnp.zeros((n_pad - n,), dtype)])
        return v.reshape(n_pad // LANES, LANES)

    def _streams_for(self, key, new_dtype):
        if key == self._cache_key and self._cache is not None:
            return self._cache
        tasks = list(self.fisher.keys())
        names = [nm for nm, _, _ in key]
        n = sum(math.prod(shape) for _, shape, _ in key)

        f_dtype = jnp.result_type(*[self.fisher[t][nm].dtype
                                    for t in tasks for nm in names])
        q_dtype = jnp.result_type(*[self.params[t][nm].dtype
                                    for t in tasks for nm in names])
        max_itemsize = max(jnp.dtype(f_dtype).itemsize,
                           jnp.dtype(q_dtype).itemsize,
                           jnp.dtype(new_dtype).itemsize)
        block_rows, n_pad, steps = _block_plan(n, max_itemsize, self._num_splits)

        fisher_trc = jnp.stack(
            [self._pack([self.fisher[t][nm] for nm in names], f_dtype, n, n_pad)
             for t in tasks])
        old_trc = jnp.stack(
            [self._pack([self.params[t][nm] for nm in names], q_dtype, n, n_pad)
             for t in tasks])

        self._cache_key = key
        self._cache = (fisher_trc, old_trc, n, n_pad, block_rows, steps)
        return self._cache

    def __call__(self, network_params):
        # network_params: list of (name, array) pairs, like named_parameters().
        network_params = list(network_params)
        if not self.fisher or not network_params:
            return jnp.float32(0.0)

        key = tuple((name, tuple(int(s) for s in p.shape), jnp.dtype(p.dtype).name)
                    for name, p in network_params)
        new_dtype = jnp.result_type(*[p.dtype for _, p in network_params])

        fisher_trc, old_trc, n, n_pad, block_rows, steps = \
            self._streams_for(key, new_dtype)

        # Only the current-params stream is rebuilt per call.
        new_rc = self._pack([p for _, p in network_params], new_dtype, n, n_pad)

        return ewc_loss_pallas(fisher_trc, new_rc, old_trc, self.ewc_lambda,
                               block_rows=block_rows, steps=steps,
                               num_splits=self._num_splits)


def _reference_loss(ewc_lambda, fisher, params, network_params):
    loss = jnp.float32(0.0)
    for task in fisher.keys():
        for name, param in network_params:
            fv = fisher[task][name].astype(jnp.float32)
            pv = params[task][name].astype(jnp.float32)
            loss = loss + ewc_lambda / 2 * jnp.sum(
                fv * (param.astype(jnp.float32) - pv) ** 2
            )
    return loss


if __name__ == "__main__":
    key = jax.random.PRNGKey(0)

    # Small synthetic "network" parameter set (deterministic init).
    param_shapes = {
        "conv.weight": (4, 4, 3, 3),   # OIHW
        "conv.bias": (4,),
        "fc.weight": (8, 32),
        "fc.bias": (8,),
    }
    keys = iter(jax.random.split(key, 64))

    # Current network parameters (f32).
    network_params = [
        (name, jax.random.normal(next(keys), shape, dtype=jnp.float32))
        for name, shape in param_shapes.items()
    ]

    # Two previous tasks, each with fisher info and consolidated params.
    tasks = ["task0", "task1"]
    fisher = {}
    old_params = {}
    for t in tasks:
        fisher[t] = {
            name: jnp.abs(jax.random.normal(next(keys), shape, dtype=jnp.float32))
            for name, shape in param_shapes.items()
        }
        old_params[t] = {
            name: jax.random.normal(next(keys), shape, dtype=jnp.float32)
            for name, shape in param_shapes.items()
        }

    # --- f32 case ------------------------------------------------------------
    loss_mod = EWCLossPallas(ewc_lambda=0.4, fisher=fisher, params=old_params)
    loss = jax.block_until_ready(loss_mod(network_params))
    ref = jax.block_until_ready(
        _reference_loss(0.4, fisher, old_params, network_params))
    assert jnp.allclose(loss, ref, rtol=1e-5, atol=1e-4), (loss, ref)

    # Second call exercises the cached fisher/old-param streams.
    loss2 = jax.block_until_ready(loss_mod(network_params))
    assert jnp.allclose(loss2, ref, rtol=1e-5, atol=1e-4), (loss2, ref)

    # --- mixed-precision case (bf16 params, f32 fisher) ----------------------
    network_params_bf16 = [(n, p.astype(jnp.bfloat16)) for n, p in network_params]
    old_params_bf16 = {t: {n: v.astype(jnp.bfloat16) for n, v in d.items()}
                       for t, d in old_params.items()}
    loss_mod_bf16 = EWCLossPallas(ewc_lambda=0.4, fisher=fisher,
                                  params=old_params_bf16)
    loss_bf16 = jax.block_until_ready(loss_mod_bf16(network_params_bf16))
    ref_bf16 = jax.block_until_ready(
        _reference_loss(0.4, fisher, old_params_bf16, network_params_bf16))
    assert jnp.allclose(loss_bf16, ref_bf16, rtol=1e-4, atol=1e-3), (loss_bf16, ref_bf16)

    print("KERNEL_OK")
</pallas_src>

<mosaic_0001>
module attributes {stable_mosaic.version = 11 : i64} {
  func.func @_ewc_kernel(%arg0: i32, %arg1: i32, %arg2: i32, %arg3: memref<1x128x128xf32, #tpu.memory_space<vmem>>, %arg4: memref<128x128xf32, #tpu.memory_space<vmem>>, %arg5: memref<1x128x128xf32, #tpu.memory_space<vmem>>, %arg6: memref<64x128xf32, #tpu.memory_space<vmem>>) attributes {dimension_semantics = [#tpu.dimension_semantics<parallel>, #tpu.dimension_semantics<arbitrary>, #tpu.dimension_semantics<arbitrary>], iteration_bounds = array<i64: 1, 1, 2>, scalar_prefetch = 0 : i64, scratch_operands = 0 : i64, tpu.core_type = #tpu.core_type<tc>, window_params = [{transform_indices = @transform_0, window_bounds = array<i64: 1, 128, 128>}, {transform_indices = @transform_1, window_bounds = array<i64: 128, 128>}, {transform_indices = @transform_2, window_bounds = array<i64: 1, 128, 128>}, {transform_indices = @transform_3, window_bounds = array<i64: 64, 128>}]} {
    %c0_i32 = arith.constant 0 : i32
    %0 = arith.cmpi eq, %arg1, %c0_i32 : i32
    %c0_i32_0 = arith.constant 0 : i32
    %1 = arith.cmpi eq, %arg2, %c0_i32_0 : i32
    %2 = arith.andi %0, %1 : i1
    %c0_i32_1 = arith.constant 0 : i32
    %3 = arith.cmpi eq, %arg1, %c0_i32_1 : i32
    %c1_i32 = arith.constant 1 : i32
    %4 = arith.cmpi eq, %arg2, %c1_i32 : i32
    %5 = arith.andi %3, %4 : i1
    %6 = arith.extui %2 : i1 to i32
    %c0_i32_2 = arith.constant 0 : i32
    %7 = arith.cmpi ne, %6, %c0_i32_2 : i32
    scf.if %7 {
      %cst_15 = arith.constant 0.000000e+00 : f32
      %30 = vector.broadcast %cst_15 : f32 to vector<64x128xf32>
      %c0_16 = arith.constant 0 : index
      %c0_17 = arith.constant 0 : index
      %31 = vector.load %arg6[%c0_16, %c0_17] : memref<64x128xf32, #tpu.memory_space<vmem>>, vector<64x128xf32>
      tpu.vector_store %arg6[%c0_16, %c0_17], %30 {strides = array<i32>} : memref<64x128xf32, #tpu.memory_space<vmem>>, vector<64x128xf32>,
    } else {
    }
    %cst = arith.constant 0.000000e+00 : f32
    %8 = vector.broadcast %cst : f32 to vector<64x128xf32>
    %c0_i32_3 = arith.constant 0 : i32
    %c128_i32 = arith.constant 128 : i32
    %9 = arith.muli %c0_i32_3, %c128_i32 : i32
    %10 = tpu.assume_multiple %9, 128 : i32
    %c0 = arith.constant 0 : index
    %11 = arith.index_cast %10 : i32 to index
    %c0_4 = arith.constant 0 : index
    %12 = vector.load %arg3[%c0, %11, %c0_4] : memref<1x128x128xf32, #tpu.memory_space<vmem>>, vector<1x128x128xf32>
    %13 = vector.shape_cast %12 : vector<1x128x128xf32> to vector<128x128xf32>
    %14 = arith.index_cast %10 : i32 to index
    %c0_5 = arith.constant 0 : index
    %15 = vector.load %arg4[%14, %c0_5] : memref<128x128xf32, #tpu.memory_space<vmem>>, vector<128x128xf32>
    %c0_6 = arith.constant 0 : index
    %16 = arith.index_cast %10 : i32 to index
    %c0_7 = arith.constant 0 : index
    %17 = vector.load %arg5[%c0_6, %16, %c0_7] : memref<1x128x128xf32, #tpu.memory_space<vmem>>, vector<1x128x128xf32>
    %18 = vector.shape_cast %17 : vector<1x128x128xf32> to vector<128x128xf32>
    %19 = arith.subf %15, %18 : vector<128x128xf32>
    %20 = arith.mulf %13, %19 : vector<128x128xf32>
    %21 = arith.mulf %20, %19 : vector<128x128xf32>
    %22 = vector.shape_cast %21 : vector<128x128xf32> to vector<2x64x128xf32>
    %cst_8 = arith.constant dense<0.000000e+00> : vector<64x128xf32>
    %23 = vector.multi_reduction <add>, %22, %cst_8 [0] : vector<2x64x128xf32> to vector<64x128xf32>
    %24 = arith.addf %8, %23 : vector<64x128xf32>
    %c1_i32_9 = arith.constant 1 : i32
    %c0_10 = arith.constant 0 : index
    %c0_11 = arith.constant 0 : index
    %25 = vector.load %arg6[%c0_10, %c0_11] : memref<64x128xf32, #tpu.memory_space<vmem>>, vector<64x128xf32>
    %26 = arith.addf %25, %24 : vector<64x128xf32>
    %c0_12 = arith.constant 0 : index
    %c0_13 = arith.constant 0 : index
    %27 = vector.load %arg6[%c0_12, %c0_13] : memref<64x128xf32, #tpu.memory_space<vmem>>, vector<64x128xf32>
    tpu.vector_store %arg6[%c0_12, %c0_13], %26 {strides = array<i32>} : memref<64x128xf32, #tpu.memory_space<vmem>>, vector<64x128xf32>,
    %28 = arith.extui %5 : i1 to i32
    %c0_i32_14 = arith.constant 0 : i32
    %29 = arith.cmpi ne, %28, %c0_i32_14 : i32
    scf.if %29 {
      %c0_15 = arith.constant 0 : index
      %c0_16 = arith.constant 0 : index
      %30 = vector.load %arg6[%c0_15, %c0_16] : memref<64x128xf32, #tpu.memory_space<vmem>>, vector<64x128xf32>
      %cst_17 = arith.constant 2.000000e-01 : f32
      %31 = vector.broadcast %cst_17 : f32 to vector<64x128xf32>
      %32 = arith.mulf %30, %31 : vector<64x128xf32>
      %c0_18 = arith.constant 0 : index
      %c0_19 = arith.constant 0 : index
      %33 = vector.load %arg6[%c0_18, %c0_19] : memref<64x128xf32, #tpu.memory_space<vmem>>, vector<64x128xf32>
      tpu.vector_store %arg6[%c0_18, %c0_19], %32 {strides = array<i32>} : memref<64x128xf32, #tpu.memory_space<vmem>>, vector<64x128xf32>,
    } else {
    }
    return
  }
  func.func @transform_0(%arg0: i32, %arg1: i32, %arg2: i32) -> (i32, i32, i32) {
    %c1_i32 = arith.constant 1 : i32
    %0 = arith.muli %arg0, %c1_i32 : i32
    %1 = arith.addi %0, %arg1 : i32
    %c0_i32 = arith.constant 0 : i32
    %c0_i32_0 = arith.constant 0 : i32
    return %arg2, %1, %c0_i32 : i32, i32, i32
  }
  func.func @transform_1(%arg0: i32, %arg1: i32, %arg2: i32) -> (i32, i32) {
    %c1_i32 = arith.constant 1 : i32
    %0 = arith.muli %arg0, %c1_i32 : i32
    %1 = arith.addi %0, %arg1 : i32
    %c0_i32 = arith.constant 0 : i32
    %c0_i32_0 = arith.constant 0 : i32
    return %1, %c0_i32 : i32, i32
  }
  func.func @transform_2(%arg0: i32, %arg1: i32, %arg2: i32) -> (i32, i32, i32) {
    %c1_i32 = arith.constant 1 : i32
    %0 = arith.muli %arg0, %c1_i32 : i32
    %1 = arith.addi %0, %arg1 : i32
    %c0_i32 = arith.constant 0 : i32
    %c0_i32_0 = arith.constant 0 : i32
    return %arg2, %1, %c0_i32 : i32, i32, i32
  }
  func.func @transform_3(%arg0: i32, %arg1: i32, %arg2: i32) -> (i32, i32) {
    %c0_i32 = arith.constant 0 : i32
    %c0_i32_0 = arith.constant 0 : i32
    return %arg0, %c0_i32 : i32, i32
  }
}

</mosaic_0001>

<bundles_post_ra>
// kernel: tpu_custom_call.1
= control target key start
LH: loop header
LB: loop body
LE: loop exit
PB: predicated region body
PF: predicated region fallthrough
CT: control target
= control target key end

     0   :  { %8 = vsyncpa [#allocation3], 0  ;;  %s1174_s0 = inlined_call_operand.hbm [shape: f32[2,128,128], index: 0, kind: input, shape index: {}]   ;;  %s1175_s1 = inlined_call_operand.hbm [shape: f32[128,128], index: 1, kind: input, shape index: {}]   ;;  %s1176_s2 = inlined_call_operand.hbm [shape: f32[2,128,128], index: 2, kind: input, shape index: {}]   ;;  %s1177_s3 = inlined_call_operand.hbm [shape: f32[64,128], index: 3, kind: output, shape index: {}]  }
   0x1   :  { %10 = vsyncpa [#allocation3 + $0x1], 0 }
   0x2   :  { %11 = vsyncpa [#allocation6], 0 }
   0x3   :  { %12 = vsyncpa [#allocation4], 0  ;;  %s895_s12 = smov 0   ;;  %s897_s13 = smov 0  }
   0x4   :  { %s899_s14 = smov 0   ;;  %s901_s15 = smov 0  }
   0x5   :  { %s903_s16 = smov 0   ;;  %s905_s17 = smov 0  }
   0x6 LB: > { %s30_s18 = sadd.s32 1, %s860_s16  ;;  %s48_s19 = sadd.s32 1, %s852_s14  ;;  %s864_s17 = sphi %s905_s17, %s18_s17   ;;  %s860_s16 = sphi %s903_s16, %s1196_s16   ;;  %s856_s15 = sphi %s901_s15, %s1195_s15   ;;  %s852_s14 = sphi %s899_s14, %s1194_s14   ;;  %s848_s13 = sphi %s897_s13, %s1193_s13   ;;  %s844_s12 = sphi %s895_s12, %s1192_s12  }
   0x7   : > { %p31_p0 = scmp.ge.s32.totalorder %s30_s18, 2  ;;  %p55_p1 = scmp.ne.s32.totalorder %s852_s14, %s848_s13 }
   0x8   : > { %p56_p2 = scmp.eq.s32.totalorder %s864_s17, 0  ;;  %p629_p5 = scmp.lt.s32.totalorder %s864_s17, 2 }
   0x9   : > { %s1198_s18 = smov (%p31_p0, %s30_s18), 0  ;;  %s186_s22 = sand.u32 1, %s864_s17  }
   0xa   : > { %p932_p3 = por %p56_p2, %p55_p1  ;;  %s43_s21 = ssub.s32 %s860_s16, %s1198_s18 }
   0xb   : > { %p46_p4 = scmp.eq.s32.totalorder %s43_s21, 0  ;;  %s188_s23 = sand.u32 1, %s852_s14  }
   0xc   : > { %s585_s25 = sshll.u32 %s188_s23, 7  ;;  %s601_s26 = sshll.u32 %s860_s16, 11 }
   0xd   : > { %s942_s24 = scalar_select %p46_p4, %s852_s14, %s48_s19  }
   0xe   : > { %s948_s29 = scalar_lea.hbm %s1174_s0, %s601_s26  ;;  %s190_s30 = scalar_lea.vmem [#allocation2], %s585_s25 }
   0xf   : > { %s200_s4 = sshll.u32 %s190_s30, 4  ;;  %p954_p6 = pnand %p629_p5, %p932_p3  ;;  %s950_s4 = int_to_ptr.vmem [resolvable:$true] %s200_s4 }
  0x10   : > { %s961_s8 = scalar_lea.hbm %s1176_s2, %s601_s26  ;;  %s214_s9 = scalar_lea.vmem [#allocation7], %s585_s25 }
  0x11   : > { %s963_s10 = sshll.u32 %s214_s9, 4  ;;  %s965_s11 = scalar_lea.sflag [#allocation3], %s186_s22  ;;  %s997_s10 = int_to_ptr.vmem [resolvable:$true] %s963_s10 }
  0x12   : > { %s688_s19 = scalar_lea.hbm %s948_s29, 2048  ;;  %p690_p8 = pneg %p954_p6 }
  0x13   : > { %p689_p7 = scmp.ne.s32.totalorder %s948_s29, %s688_s19  ;;  %s693_s23 = scalar_lea.hbm %s1174_s0, 4096 }
  0x14   : > { %p694_p11 = scmp.lt.u32.totalorder %s948_s29, %s1174_s0  ;;  %p695_p12 = scmp.lt.u32.totalorder %s693_s23, %s688_s19 }
  0x15   : > { %p691_p9 = pnand %p690_p8, %p689_p7  ;;  %p697_p0 = scmp.lt.u32.totalorder %s688_s19, %s948_s29 }
  0x16   : > { %p696_p13 = por %p695_p12, %p694_p11 }
  0x17   : > { %p692_p10 = pneg %p691_p9 }
  0x18   : > { %p698_p1 = por %p697_p0, %p696_p13 }
  0x1a   : > { %p699_p2 = pnand %p698_p1, %p692_p10 }
  0x1c   : > { %702 = shalt.err (!%p699_p2)
}
  0x1d   : > { %s703_s22 = scalar_lea.vmem %s950_s4, 2048  ;;  %s866_s25 = smov [#allocation2]  }
  0x1e   : > { %p704_p3 = scmp.ne.s32.totalorder %s950_s4, %s703_s22  ;;  %s708_s28 = sshll.u32 %s866_s25, 4  ;;  %s709_s28 = int_to_ptr.vmem [resolvable:$false] %s708_s28 }
  0x1f   : > { %s710_s30 = scalar_lea.vmem %s709_s28, 4096  ;;  %p711_p7 = scmp.lt.s32.totalorder %s950_s4, %s709_s28 }
  0x20   : > { %p706_p4 = pnand %p704_p3, %p690_p8  ;;  %p712_p9 = scmp.lt.s32.totalorder %s710_s30, %s703_s22 }
  0x22   : > { %p707_p5 = pneg %p706_p4  ;;  %p713_p11 = por %p712_p9, %p711_p7 }
  0x24   : > { %p714_p12 = pnand %p713_p11, %p707_p5 }
  0x26   : > { %717 = shalt.err (!%p714_p12)
}
  0x27   : > { %s867_s6 = smov 128   ;;  %s868_s7 = smov 8  }
  0x28   : > { %624 = dma.hbm_to_vmem [thread:$0]  (!%p954_p6), %s948_s29, 2048, %s950_s4, %s965_s11, %s867_s6, %s867_s6, %s868_s7  }
  0x29   : > { %s1000_s9 = sadd.s32 4294967295, %s864_s17   ;;  %p61_p10 = scmp.ne.s32.totalorder %s848_s13, %s844_s12 }
  0x2a   : > { %p1178_p13 = scmp.eq.s32.totalorder %s1000_s9, 0  ;;  %p582_p0 = scmp.ge.s32.totalorder %s864_s17, 1 }
  0x2b   : > { %p156_p1 = scmp.lt.s32.totalorder %s864_s17, 3  ;;  %s869_s29 = smov [#allocation5]  }
  0x2c   : > { %p1009_p2 = por %p1178_p13, %p61_p10  ;;  %s1017_s4 = sshll.u32 %s869_s29, 4  ;;  %s173_s4 = int_to_ptr.vmem [resolvable:$true] %s1017_s4 }
  0x2d   : > { %p1013_p3 = pnand %p582_p0, %p156_p1  ;;  %s718_s12 = scalar_lea.hbm %s961_s8, 2048 }
  0x2e   : > { %s1183_s19 = scalar_select %p1009_p2, 1, 0 }
  0x2f   : > { %s1184_s20 = scalar_select %p1013_p3, 1, 0 }
  0x30   : > { %p719_p5 = scmp.ne.s32.totalorder %s961_s8, %s718_s12  ;;  %s723_s27 = scalar_lea.hbm %s1176_s2, 4096 }
  0x31   : > { %p724_p11 = scmp.lt.u32.totalorder %s961_s8, %s1176_s2  ;;  %p725_p12 = scmp.lt.u32.totalorder %s723_s27, %s718_s12 }
  0x32   : > { %p721_p7 = pnand %p719_p5, %p690_p8  ;;  %p727_p0 = scmp.lt.u32.totalorder %s718_s12, %s961_s8 }
  0x33   : > { %p726_p10 = por %p725_p12, %p724_p11 }
  0x34   : > { %p722_p9 = pneg %p721_p7 }
  0x35   : > { %p728_p1 = por %p727_p0, %p726_p10 }
  0x37   : > { %p729_p13 = pnand %p728_p1, %p722_p9 }
  0x39   : > { %732 = shalt.err (!%p729_p13)
}
  0x3a   : > { %s733_s25 = scalar_lea.vmem %s997_s10, 2048  ;;  %s870_s28 = smov [#allocation7]  }
  0x3b   : > { %p734_p5 = scmp.ne.s32.totalorder %s997_s10, %s733_s25  ;;  %s738_s30 = sshll.u32 %s870_s28, 4  ;;  %s739_s30 = int_to_ptr.vmem [resolvable:$false] %s738_s30 }
  0x3c   : > { %s740_s29 = scalar_lea.vmem %s739_s30, 4096  ;;  %p741_p2 = scmp.lt.s32.totalorder %s997_s10, %s739_s30 }
  0x3d   : > { %p736_p7 = pnand %p734_p5, %p690_p8  ;;  %p742_p11 = scmp.lt.s32.totalorder %s740_s29, %s733_s25 }
  0x3f   : > { %p737_p4 = pneg %p736_p7  ;;  %p743_p12 = por %p742_p11, %p741_p2 }
  0x41   : > { %p744_p10 = pnand %p743_p12, %p737_p4 }
  0x43   : > { %747 = shalt.err (!%p744_p10)
}
  0x44   : > { %627 = dma.hbm_to_vmem [thread:$0]  (!%p954_p6), %s961_s8, 2048, %s997_s10, %s965_s11, %s867_s6, %s867_s6, %s868_s7  }
  0x45   : > { %p1185_p8 = scmp.eq.s32.totalorder %s1000_s9, 0  ;;  %p1186_p13 = pneg %p1013_p3 }
  0x46   : > { %s748_s23 = scalar_lea.hbm %s1175_s1, 2048 }
  0x47   : > { %p1054_p9 = pnand %p1186_p13, %p1185_p8  ;;  %p749_p2 = scmp.ne.s32.totalorder %s1175_s1, %s748_s23 }
  0x48   : > { %p755_p1 = scmp.lt.u32.totalorder %s748_s23, %s1175_s1 }
  0x49   : > { %p750_p4 = pneg %p1054_p9 }
  0x4b   : > { %p751_p6 = pnand %p750_p4, %p749_p2 }
  0x4d   : > { %p752_p0 = pneg %p751_p6 }
  0x4f   : > { %p757_p5 = pnand %p755_p1, %p752_p0 }
  0x51   : > { %760 = shalt.err (!%p757_p5)
}
  0x52   : > { %s761_s11 = scalar_lea.vmem %s173_s4, 2048  ;;  %p769_p10 = scmp.lt.s32.totalorder %s173_s4, %s173_s4 }
  0x53   : > { %p762_p7 = scmp.ne.s32.totalorder %s173_s4, %s761_s11  ;;  %p770_p8 = scmp.lt.s32.totalorder %s761_s11, %s761_s11 }
  0x55   : > { %p764_p11 = pnand %p762_p7, %p750_p4  ;;  %p771_p13 = por %p770_p8, %p769_p10 }
  0x57   : > { %p765_p12 = pneg %p764_p11 }
  0x59   : > { %p772_p3 = pnand %p771_p13, %p765_p12 }
  0x5b   : > { %775 = shalt.err (!%p772_p3)
}
  0x5c   : > { %620 = dma.hbm_to_vmem [thread:$0]  (!%p1054_p9), %s1175_s1, 2048, %s173_s4, [#allocation6], %s867_s6, %s867_s6, %s868_s7  }
  0x5d   : > { %p1188_p2 = scmp.ne.s32.totalorder %s1184_s20, 0 }
  0x5e   : > { %s238_s28 = sand.u32 (!%p1188_p2), 1, %s1000_s9   ;;  %s240_s30 = sand.u32 (!%p1188_p2), 1, %s848_s13  }
  0x5f   : > { %236 = sbr.rel (%p1188_p2) target bundleno = 185 (0xb9), region = 32  ;;  %s592_s29 = sshll.u32 (!%p1188_p2), %s240_s30, 7 }
  0x60   : > { %s239_s21 = scalar_lea.sflag (!%p1188_p2), [#allocation3], %s238_s28  ;;  %s1081_s5 = scalar_lea.vmem (!%p1188_p2), [#allocation2], %s592_s29 }
  0x61   : > { %p1189_p3 = scmp.ne.s32.totalorder (!%p1188_p2), %s1183_s19, 0 }
  0x66   : > { %827 = dma.done.wait (%p1189_p3), %s239_s21, 2048  }
  0x67   : > { %829 = vsyncadd (%p1189_p3), %s239_s21, 4294965248  ;;  %p1190_p4 = scmp.eq.s32.totalorder %s1000_s9, 0 }
  0x69   : > { %831 = dma.done.wait (%p1190_p4), [#allocation6], 2048   ;;  %p1191_p9 = pmov %p1190_p4 }
  0x6a   : > { %s1091_s6 = scalar_lea.vmem [#allocation7], %s592_s29 }
  0x6b   : > { %833 = vsyncadd (%p1191_p9), [#allocation6], 4294965248 }
  0x6c   : > { %835 = dma.done.wait (%p1189_p3), %s239_s21, 2048  }
  0x6d   : > { %837 = vsyncadd (%p1189_p3), %s239_s21, 4294965248  ;;  %p286_p6 = scmp.eq.s32.totalorder %s856_s15, 0  ;;  %p289_p0 = scmp.eq.s32.totalorder %s856_s15, 1 }
  0x6e   : > { %v871_v0 = vmov (%p286_p6), 0.0  }
  0x6f   : > { %293 = sbr.rel (!%p286_p6) target bundleno = 118 (0x76), region = 48  ;;  %294 = vst [vmem:[#allocation8] sm:$0xff] (%p286_p6), %v871_v0  ;;  %295 = vst [vmem:[#allocation8 + $0x8] sm:$0xff] (%p286_p6), %v871_v0 }
  0x70   : > { %296 = vst [vmem:[#allocation8 + $0x10] sm:$0xff] (%p286_p6), %v871_v0  ;;  %297 = vst [vmem:[#allocation8 + $0x18] sm:$0xff] (%p286_p6), %v871_v0 }
  0x71   : > { %298 = vst [vmem:[#allocation8 + $0x20] sm:$0xff] (%p286_p6), %v871_v0  ;;  %299 = vst [vmem:[#allocation8 + $0x28] sm:$0xff] (%p286_p6), %v871_v0 }
  0x72   : > { %300 = vst [vmem:[#allocation8 + $0x30] sm:$0xff] (%p286_p6), %v871_v0  ;;  %301 = vst [vmem:[#allocation8 + $0x38] sm:$0xff] (%p286_p6), %v871_v0 }
  0x76 PF: > { %v302_v1 = vld [vmem:[%s1081_s5] sm:$0xff]  ;;  %v303_v9 = vld [vmem:[%s1081_s5 + $0x8] sm:$0xff]  ;;  %v304_v19 = vld [vmem:[%s1081_s5 + $0x10] sm:$0xff] }
  0x77   : > { %v310_v2 = vld [vmem:[%s1081_s5 + $0x40] sm:$0xff]  ;;  %v319_v10 = vld [vmem:[#allocation5 + $0x8] sm:$0xff]  ;;  %v320_v20 = vld [vmem:[#allocation5 + $0x10] sm:$0xff] }
  0x78   : > { %v318_v3 = vld [vmem:[#allocation5] sm:$0xff]  ;;  %v327_v11 = vld [vmem:[#allocation5 + $0x48] sm:$0xff]  ;;  %v328_v21 = vld [vmem:[#allocation5 + $0x50] sm:$0xff] }
  0x79   : > { %v326_v4 = vld [vmem:[#allocation5 + $0x40] sm:$0xff]  ;;  %v335_v12 = vld [vmem:[%s1091_s6 + $0x8] sm:$0xff]  ;;  %v312_v25 = vld [vmem:[%s1081_s5 + $0x50] sm:$0xff] }
  0x7a   : > { %v334_v5 = vld [vmem:[%s1091_s6] sm:$0xff]  ;;  %v311_v15 = vld [vmem:[%s1081_s5 + $0x48] sm:$0xff]  ;;  %v351_v17 = vsub.f32 %v319_v10, %v335_v12  ;;  %v336_v26 = vld [vmem:[%s1091_s6 + $0x10] sm:$0xff] }
  0x7b   : > { %v342_v6 = vld [vmem:[%s1091_s6 + $0x40] sm:$0xff]  ;;  %v350_v7 = vsub.f32 %v318_v3, %v334_v5  ;;  %v343_v16 = vld [vmem:[%s1091_s6 + $0x48] sm:$0xff]  ;;  %v344_v27 = vld [vmem:[%s1091_s6 + $0x50] sm:$0xff]  ;;  %v352_v30 = vsub.f32 %v320_v20, %v336_v26 }
  0x7c   : > { %v358_v8 = vsub.f32 %v326_v4, %v342_v6  ;;  %v359_v18 = vsub.f32 %v327_v11, %v343_v16  ;;  %v367_v24 = vmul.f32 %v351_v17, %v303_v9  ;;  %v414_v28 = vld [vmem:[#allocation8] sm:$0xff]  ;;  %v360_v31 = vsub.f32 %v328_v21, %v344_v27  ;;  %v305_v32 = vld [vmem:[%s1081_s5 + $0x18] sm:$0xff]  ;;  %v415_v40 = vld [vmem:[#allocation8 + $0x8] sm:$0xff] }
  0x7d   : > { %v366_v13 = vmul.f32 %v350_v7, %v302_v1  ;;  %v321_v33 = vld [vmem:[#allocation5 + $0x18] sm:$0xff]  ;;  %v368_v41 = vmul.f32 %v352_v30, %v304_v19  ;;  %v322_v47 = vld [vmem:[#allocation5 + $0x20] sm:$0xff]  ;;  %v416_v57 = vld [vmem:[#allocation8 + $0x10] sm:$0xff] }
  0x7e   : > { %v374_v14 = vmul.f32 %v358_v8, %v310_v2  ;;  %v375_v29 = vmul.f32 %v359_v18, %v311_v15  ;;  %v383_v35 = vmul.f32 %v367_v24, %v351_v17  ;;  %v329_v36 = vld [vmem:[#allocation5 + $0x58] sm:$0xff]  ;;  %v376_v42 = vmul.f32 %v360_v31, %v312_v25  ;;  %v330_v48 = vld [vmem:[#allocation5 + $0x60] sm:$0xff]  ;;  %v323_v61 = vld [vmem:[#allocation5 + $0x28] sm:$0xff] }
  0x7f   : > { %v382_v22 = vmul.f32 %v366_v13, %v350_v7  ;;  %v337_v37 = vld [vmem:[%s1091_s6 + $0x18] sm:$0xff]  ;;  %v338_v49 = vld [vmem:[%s1091_s6 + $0x20] sm:$0xff]  ;;  %v384_v51 = vmul.f32 %v368_v41, %v352_v30  ;;  %v331_v62 = vld [vmem:[#allocation5 + $0x68] sm:$0xff] }
  0x80   : > { %v390_v23 = vmul.f32 %v374_v14, %v358_v8  ;;  %v345_v38 = vld [vmem:[%s1091_s6 + $0x58] sm:$0xff]  ;;  %v391_v39 = vmul.f32 %v375_v29, %v359_v18  ;;  %v353_v44 = vsub.f32 %v321_v33, %v337_v37  ;;  %v392_v52 = vmul.f32 %v376_v42, %v360_v31  ;;  %v306_v54 = vld [vmem:[%s1081_s5 + $0x20] sm:$0xff]  ;;  %v307_v2 = vld [vmem:[%s1081_s5 + $0x28] sm:$0xff] }
  0x81   : > { %v313_v43 = vld [vmem:[%s1081_s5 + $0x58] sm:$0xff]  ;;  %v361_v46 = vsub.f32 %v329_v36, %v345_v38  ;;  %v314_v55 = vld [vmem:[%s1081_s5 + $0x60] sm:$0xff]  ;;  %v354_v59 = vsub.f32 %v322_v47, %v338_v49  ;;  %v339_v3 = vld [vmem:[%s1091_s6 + $0x28] sm:$0xff] }
  0x82   : > { %v398_v34 = vadd.f32 %v390_v23, %v382_v22  ;;  %v399_v50 = vadd.f32 %v391_v39, %v383_v35  ;;  %v369_v53 = vmul.f32 %v353_v44, %v305_v32  ;;  %v346_v56 = vld [vmem:[%s1091_s6 + $0x60] sm:$0xff]  ;;  %v400_v0 = vadd.f32 %v392_v52, %v384_v51  ;;  %v347_v4 = vld [vmem:[%s1091_s6 + $0x68] sm:$0xff]  ;;  %v417_v6 = vld [vmem:[#allocation8 + $0x18] sm:$0xff] }
  0x83   : > { %v377_v58 = vmul.f32 %v361_v46, %v313_v43  ;;  %v362_v60 = vsub.f32 %v330_v48, %v346_v56  ;;  %v370_v7 = vmul.f32 %v354_v59, %v306_v54  ;;  %v315_v9 = vld [vmem:[%s1081_s5 + $0x68] sm:$0xff]  ;;  %v355_v10 = vsub.f32 %v323_v61, %v339_v3  ;;  %v324_v11 = vld [vmem:[#allocation5 + $0x30] sm:$0xff]  ;;  %v418_v13 = vld [vmem:[#allocation8 + $0x20] sm:$0xff] }
  0x84   : > { %v422_v45 = vadd.f32 %v414_v28, %v398_v34  ;;  %v423_v63 = vadd.f32 %v415_v40, %v399_v50  ;;  %v385_v1 = vmul.f32 %v369_v53, %v353_v44  ;;  %v424_v12 = vadd.f32 %v416_v57, %v400_v0  ;;  %v332_v15 = vld [vmem:[#allocation5 + $0x70] sm:$0xff]  ;;  %v309_v24 = vld [vmem:[%s1081_s5 + $0x38] sm:$0xff]  ;;  %v419_v42 = vld [vmem:[#allocation8 + $0x28] sm:$0xff] }
  0x85   : > { %v393_v5 = vmul.f32 %v377_v58, %v361_v46  ;;  %v378_v8 = vmul.f32 %v362_v60, %v314_v55  ;;  %v363_v14 = vsub.f32 %v331_v62, %v347_v4  ;;  %v340_v16 = vld [vmem:[%s1091_s6 + $0x30] sm:$0xff]  ;;  %v386_v19 = vmul.f32 %v370_v7, %v354_v59  ;;  %v325_v28 = vld [vmem:[#allocation5 + $0x38] sm:$0xff] }
  0x86   : > { %430 = vst [vmem:[#allocation8] sm:$0xff] %v422_v45  ;;  %431 = vst [vmem:[#allocation8 + $0x8] sm:$0xff] %v423_v63  ;;  %v348_v17 = vld [vmem:[%s1091_s6 + $0x70] sm:$0xff]  ;;  %v371_v21 = vmul.f32 %v355_v10, %v307_v2  ;;  %v356_v26 = vsub.f32 %v324_v11, %v340_v16  ;;  %v333_v29 = vld [vmem:[#allocation5 + $0x78] sm:$0xff] }
  0x87   : > { %v401_v18 = vadd.f32 %v393_v5, %v385_v1  ;;  %v394_v20 = vmul.f32 %v378_v8, %v362_v60  ;;  %v308_v22 = vld [vmem:[%s1081_s5 + $0x30] sm:$0xff]  ;;  %432 = vst [vmem:[#allocation8 + $0x10] sm:$0xff] %v424_v12  ;;  %v379_v25 = vmul.f32 %v363_v14, %v315_v9  ;;  %v364_v27 = vsub.f32 %v332_v15, %v348_v17  ;;  %v341_v30 = vld [vmem:[%s1091_s6 + $0x38] sm:$0xff] }
  0x88   : > { %v316_v23 = vld [vmem:[%s1081_s5 + $0x70] sm:$0xff]  ;;  %v387_v33 = vmul.f32 %v371_v21, %v355_v10  ;;  %v317_v34 = vld [vmem:[%s1081_s5 + $0x78] sm:$0xff]  ;;  %v357_v36 = vsub.f32 %v325_v28, %v341_v30  ;;  %v372_v38 = vmul.f32 %v356_v26, %v308_v22 }
  0x89   : > { %v425_v31 = vadd.f32 %v417_v6, %v401_v18  ;;  %v402_v32 = vadd.f32 %v394_v20, %v386_v19  ;;  %v349_v35 = vld [vmem:[%s1091_s6 + $0x78] sm:$0xff]  ;;  %v395_v37 = vmul.f32 %v379_v25, %v363_v14  ;;  %v380_v39 = vmul.f32 %v364_v27, %v316_v23  ;;  %v420_v48 = vld [vmem:[#allocation8 + $0x30] sm:$0xff] }
  0x8a   : > { %v365_v40 = vsub.f32 %v333_v29, %v349_v35  ;;  %v373_v43 = vmul.f32 %v357_v36, %v309_v24  ;;  %v388_v45 = vmul.f32 %v372_v38, %v356_v26  ;;  %v421_v53 = vld [vmem:[#allocation8 + $0x38] sm:$0xff] }
  0x8b   : > { %433 = vst [vmem:[#allocation8 + $0x18] sm:$0xff] %v425_v31  ;;  %v426_v41 = vadd.f32 %v418_v13, %v402_v32  ;;  %v403_v44 = vadd.f32 %v395_v37, %v387_v33  ;;  %v396_v46 = vmul.f32 %v380_v39, %v364_v27 }
  0x8c   : > { %v381_v47 = vmul.f32 %v365_v40, %v317_v34  ;;  %v389_v49 = vmul.f32 %v373_v43, %v357_v36 }
  0x8d   : > { %434 = vst [vmem:[#allocation8 + $0x20] sm:$0xff] %v426_v41  ;;  %v427_v50 = vadd.f32 %v419_v42, %v403_v44  ;;  %v404_v51 = vadd.f32 %v396_v46, %v388_v45  ;;  %v440_v57 = vld [vmem:[#allocation8] sm:$0xff] (%p289_p0)  ;;  %v441_v58 = vld [vmem:[#allocation8 + $0x8] sm:$0xff] (%p289_p0) }
  0x8e   : > { %v397_v52 = vmul.f32 %v381_v47, %v365_v40  ;;  %439 = sbr.rel (!%p289_p0) target bundleno = 159 (0x9f), region = 52  ;;  %v442_v59 = vld [vmem:[#allocation8 + $0x10] sm:$0xff] (%p289_p0)  ;;  %v448_v60 = vmul.f32 (%p289_p0), 0.2, %v440_v57  ;;  %v449_v61 = vmul.f32 (%p289_p0), 0.2, %v441_v58 }
  0x8f   : > { %435 = vst [vmem:[#allocation8 + $0x28] sm:$0xff] %v427_v50  ;;  %v428_v54 = vadd.f32 %v420_v48, %v404_v51  ;;  %v450_v62 = vmul.f32 (%p289_p0), 0.2, %v442_v59 }
  0x90   : > { %v405_v55 = vadd.f32 %v397_v52, %v389_v49  ;;  %456 = vst [vmem:[#allocation8] sm:$0xff] (%p289_p0), %v448_v60  ;;  %457 = vst [vmem:[#allocation8 + $0x8] sm:$0xff] (%p289_p0), %v449_v61 }
  0x91   : > { %436 = vst [vmem:[#allocation8 + $0x30] sm:$0xff] %v428_v54  ;;  %458 = vst [vmem:[#allocation8 + $0x10] sm:$0xff] (%p289_p0), %v450_v62 }
  0x92   : > { %v429_v56 = vadd.f32 %v421_v53, %v405_v55  ;;  %v443_v63 = vld [vmem:[#allocation8 + $0x18] sm:$0xff] (%p289_p0) }
  0x93   : > { %v451_v2 = vmul.f32 (%p289_p0), 0.2, %v443_v63 }
  0x94   : > { %437 = vst [vmem:[#allocation8 + $0x38] sm:$0xff] %v429_v56  ;;  %v444_v0 = vld [vmem:[#allocation8 + $0x20] sm:$0xff] (%p289_p0) }
  0x95   : > { %v452_v3 = vmul.f32 0.2, %v444_v0  ;;  %459 = vst [vmem:[#allocation8 + $0x18] sm:$0xff] %v451_v2 }
  0x96   : > { %v445_v1 = vld [vmem:[#allocation8 + $0x28] sm:$0xff] }
  0x97   : > { %v453_v4 = vmul.f32 0.2, %v445_v1  ;;  %460 = vst [vmem:[#allocation8 + $0x20] sm:$0xff] %v452_v3 }
  0x98   : > { %v446_v5 = vld [vmem:[#allocation8 + $0x30] sm:$0xff] }
  0x99   : > { %461 = vst [vmem:[#allocation8 + $0x28] sm:$0xff] %v453_v4  ;;  %v454_v7 = vmul.f32 0.2, %v446_v5 }
  0x9b   : > { %v447_v6 = vld [vmem:[#allocation8 + $0x38] sm:$0xff]  ;;  %462 = vst [vmem:[#allocation8 + $0x30] sm:$0xff] %v454_v7 }
  0x9c   : > { %v455_v8 = vmul.f32 0.2, %v447_v6 }
  0x9e   : > { %463 = vst [vmem:[#allocation8 + $0x38] sm:$0xff] %v455_v8 }
  0x9f PF: > { %p631_p1 = scmp.eq.s32.totalorder %s1000_s9, 1  ;;  %s872_s15 = smov [#allocation8]  }
  0xa0   : > { %s473_s7 = sshll.u32 %s872_s15, 4  ;;  %s474_s7 = int_to_ptr.vmem [resolvable:$true] %s473_s7 }
  0xa1   : > { %s776_s19 = scalar_lea.vmem %s474_s7, 1024  ;;  %p783_p12 = scmp.lt.s32.totalorder %s474_s7, %s474_s7 }
  0xa2   : > { %p777_p5 = scmp.ne.s32.totalorder %s474_s7, %s776_s19  ;;  %p784_p10 = scmp.lt.s32.totalorder %s776_s19, %s776_s19 }
  0xa4   : > { %p778_p7 = pnand %p777_p5, %p631_p1  ;;  %p785_p8 = por %p784_p10, %p783_p12 }
  0xa6   : > { %p779_p11 = pneg %p778_p7 }
  0xa8   : > { %p786_p13 = pnand %p785_p8, %p779_p11 }
  0xaa   : > { %789 = shalt.err (!%p786_p13)
}
  0xab   : > { %s790_s12 = scalar_lea.hbm %s1177_s3, 1024 }
  0xac   : > { %p791_p2 = scmp.ne.s32.totalorder %s1177_s3, %s790_s12  ;;  %p796_p9 = scmp.lt.u32.totalorder %s790_s12, %s1177_s3 }
  0xae   : > { %p792_p3 = pnand %p791_p2, %p631_p1 }
  0xb0   : > { %p793_p4 = pneg %p792_p3 }
  0xb2   : > { %p798_p6 = pnand %p796_p9, %p793_p4 }
  0xb4   : > { %801 = shalt.err (!%p798_p6)
}
  0xb5   : > { %s873_s10 = smov 128   ;;  %s874_s11 = smov 8  }
  0xb6   : > { %614 = dma.vmem_to_hbm [thread:$0]  (%p631_p1), %s474_s7, 1024, %s1177_s3, [#allocation4], %s873_s10, %s873_s10, %s874_s11  }
  0xb7   : > { %839 = dma.done.wait (%p631_p1), [#allocation4], 1024  }
  0xb8   : > { %841 = vsyncadd (%p631_p1), [#allocation4], 4294966272 }
  0xb9 PF: > { %s18_s17 = sadd.s32 1, %s864_s17   ;;  %s1192_s12 = smov %s848_s13 }
  0xba   : > { %p15_p0 = scmp.ge.s32.totalorder %s18_s17, 4   ;;  %s1193_s13 = smov %s852_s14 }
  0xbb   : > { %s1194_s14 = smov %s942_s24  ;;  %s1195_s15 = smov %s860_s16 }
  0xbc   : > { %s1196_s16 = smov %s1198_s18  ;;  %17 = sbr.rel (!%p15_p0) target bundleno = 6 (0x6), region = 94 }
  0xc3   :  { %489 = vsyncpa [#allocation3], 1 }
  0xc4   :  { %491 = vsyncpa [#allocation3 + $0x1], 1 }
  0xc5   :  { %492 = vsyncpa [#allocation6], 1 }
  0xc6   :  { %493 = vsyncpa [#allocation4], 1 }
  0xc7   :  { %495 = vsyncpa [#allocation4 + $0x1], 1 }

</bundles_post_ra>
